<compile_context>
chip_gen: v5e
topology: v5e:2x2
jax: 0.10.0
libtpu: 0.0.40
codegen_flags: <defaults>
</compile_context>

<pallas_src>
import jax
import jax.numpy as jnp
from jax.experimental import pallas as pl
from jax.experimental.pallas import tpu as pltpu


STATE_DIM = 32
ACTION_DIM = 8
HIDDEN1 = 128
HIDDEN2 = 64
DROPOUT_P = 0.5

_LANES = 128  # pad narrow feature dims up to one full lane group


def _mlp_body(x, w1, b1, w2, b2, w3, b3, mask=None):
    # fc1 + relu (bf16 inputs, f32 MXU accumulation)
    h1 = jnp.dot(x, w1, preferred_element_type=jnp.float32) + b1
    h1 = jnp.maximum(h1, 0.0)
    # dropout: pre-scaled keep mask (keep * 1/(1-p)) -> one VPU multiply
    if mask is not None:
        h1 = h1 * mask
    # fc2 + relu
    h2 = jnp.dot(h1.astype(w2.dtype), w2, preferred_element_type=jnp.float32) + b2
    h2 = jnp.maximum(h2, 0.0)
    # fc3 (no activation)
    return jnp.dot(h2.astype(w3.dtype), w3, preferred_element_type=jnp.float32) + b3


def _kernel_train(x_ref, mask_ref, w1_ref, b1_ref, w2_ref, b2_ref,
                  w3_ref, b3_ref, o_ref):
    o_ref[...] = _mlp_body(
        x_ref[...], w1_ref[...], b1_ref[...], w2_ref[...], b2_ref[...],
        w3_ref[...], b3_ref[...], mask=mask_ref[...]).astype(o_ref.dtype)


def _kernel_eval(x_ref, w1_ref, b1_ref, w2_ref, b2_ref, w3_ref, b3_ref, o_ref):
    o_ref[...] = _mlp_body(
        x_ref[...], w1_ref[...], b1_ref[...], w2_ref[...], b2_ref[...],
        w3_ref[...], b3_ref[...]).astype(o_ref.dtype)


def _prep_params(params):
    """Cast weights to bf16 and zero-pad 64/8-wide dims up to 128 lanes.

    Zero padding is numerically transparent: padded h2 columns are
    relu(0 + 0) = 0 and multiply zero rows of w3; padded output columns are
    exactly 0 and get sliced away in the wrapper.
    """
    h2 = params["w2"].shape[1]
    act = params["w3"].shape[1]
    w1 = params["w1"].astype(jnp.bfloat16)
    b1 = params["b1"].astype(jnp.float32)
    w2 = jnp.pad(params["w2"], ((0, 0), (0, _LANES - h2))).astype(jnp.bfloat16)
    b2 = jnp.pad(params["b2"], ((0, 0), (0, _LANES - h2))).astype(jnp.float32)
    w3 = jnp.pad(params["w3"], ((0, _LANES - h2), (0, _LANES - act))).astype(jnp.bfloat16)
    b3 = jnp.pad(params["b3"], ((0, 0), (0, _LANES - act))).astype(jnp.float32)
    return w1, b1, w2, b2, w3, b3


def model_with_dropout_forward(x, params, *, key=None, dropout_p=DROPOUT_P,
                               training=True, tile_b=1024):
    """Full MLP forward pass as a single batch-tiled Pallas TPU kernel.

    x: (B, state_dim) float32
    params: dict with w1 (state_dim,128), b1 (1,128), w2 (128,64), b2 (1,64),
            w3 (64,action_dim), b3 (1,action_dim)
    """
    B, state_dim = x.shape
    hidden1 = params["w1"].shape[1]
    action_dim = params["w3"].shape[1]

    w1, b1, w2, b2, w3, b3 = _prep_params(params)
    xb = x.astype(jnp.bfloat16)

    # Batch tile: whole batch when small, else a multiple of 8 sublanes.
    # tile_b ~ 512-2048 keeps double-buffered blocks far under the scoped
    # VMEM limit on all of v5e/v6e/v7x.
    if B <= tile_b:
        tb = B
    else:
        tb = max(8, (tile_b // 8) * 8)
    grid = (pl.cdiv(B, tb),)

    const = lambda i: (0, 0)   # weights/biases: VMEM-resident, fetched once
    rows = lambda i: (i, 0)    # activations: tiled over the batch

    w_specs = [
        pl.BlockSpec((state_dim, hidden1), const),
        pl.BlockSpec((1, hidden1), const),
        pl.BlockSpec((hidden1, _LANES), const),
        pl.BlockSpec((1, _LANES), const),
        pl.BlockSpec((_LANES, _LANES), const),
        pl.BlockSpec((1, _LANES), const),
    ]
    x_spec = pl.BlockSpec((tb, state_dim), rows)
    out_spec = pl.BlockSpec((tb, _LANES), rows)

    cparams = pltpu.CompilerParams(dimension_semantics=("parallel",))

    if training and dropout_p > 0.0:
        if key is None:
            key = jax.random.PRNGKey(0)
        keep = jax.random.bernoulli(key, 1.0 - dropout_p, (B, hidden1))
        mask = keep.astype(jnp.float32) * (1.0 / (1.0 - dropout_p))
        out = pl.pallas_call(
            _kernel_train,
            out_shape=jax.ShapeDtypeStruct((B, _LANES), jnp.float32),
            grid=grid,
            in_specs=[x_spec, pl.BlockSpec((tb, hidden1), rows)] + w_specs,
            out_specs=out_spec,
            compiler_params=cparams,
        )(xb, mask, w1, b1, w2, b2, w3, b3)
    else:
        out = pl.pallas_call(
            _kernel_eval,
            out_shape=jax.ShapeDtypeStruct((B, _LANES), jnp.float32),
            grid=grid,
            in_specs=[x_spec] + w_specs,
            out_specs=out_spec,
            compiler_params=cparams,
        )(xb, w1, b1, w2, b2, w3, b3)

    return out[:, :action_dim]


def init_params(key, state_dim=STATE_DIM, action_dim=ACTION_DIM):
    """Init matching PyTorch nn.Linear default (U[-1/sqrt(fan_in), 1/sqrt(fan_in)])."""
    ks = jax.random.split(key, 6)

    def linear(kw, kb, fan_in, fan_out):
        bound = 1.0 / jnp.sqrt(fan_in)
        w = jax.random.uniform(kw, (fan_in, fan_out), jnp.float32, -bound, bound)
        b = jax.random.uniform(kb, (1, fan_out), jnp.float32, -bound, bound)
        return w, b

    w1, b1 = linear(ks[0], ks[1], state_dim, HIDDEN1)
    w2, b2 = linear(ks[2], ks[3], HIDDEN1, HIDDEN2)
    w3, b3 = linear(ks[4], ks[5], HIDDEN2, action_dim)
    return dict(w1=w1, b1=b1, w2=w2, b2=b2, w3=w3, b3=b3)


if __name__ == "__main__":
    key = jax.random.PRNGKey(0)
    k_param, k_x, k_drop = jax.random.split(key, 3)

    B = 8
    params = init_params(k_param)
    x = jax.random.normal(k_x, (B, STATE_DIM), dtype=jnp.float32)

    # Pure-JAX reference using the same bf16-matmul / f32-accumulate recipe.
    def ref_forward(mask=None):
        xb = x.astype(jnp.bfloat16)
        h1 = jnp.maximum(
            jnp.dot(xb, params["w1"].astype(jnp.bfloat16),
                    preferred_element_type=jnp.float32) + params["b1"], 0.0)
        if mask is not None:
            h1 = h1 * mask
        h2 = jnp.maximum(
            jnp.dot(h1.astype(jnp.bfloat16), params["w2"].astype(jnp.bfloat16),
                    preferred_element_type=jnp.float32) + params["b2"], 0.0)
        return jnp.dot(h2.astype(jnp.bfloat16), params["w3"].astype(jnp.bfloat16),
                       preferred_element_type=jnp.float32) + params["b3"]

    # Training-mode forward (dropout active, as the module defines it).
    y_train = jax.block_until_ready(
        model_with_dropout_forward(x, params, key=k_drop, training=True))
    assert y_train.shape == (B, ACTION_DIM) and y_train.dtype == jnp.float32

    # Check training-mode output against the reference with the same mask.
    keep = jax.random.bernoulli(k_drop, 1.0 - DROPOUT_P, (B, HIDDEN1))
    mask = keep.astype(jnp.float32) * (1.0 / (1.0 - DROPOUT_P))
    assert jnp.allclose(y_train, ref_forward(mask), atol=1e-3, rtol=1e-3)

    # Eval mode (dropout = identity).
    y_eval = jax.block_until_ready(
        model_with_dropout_forward(x, params, training=False))
    assert y_eval.shape == (B, ACTION_DIM)
    assert jnp.allclose(y_eval, ref_forward(), atol=1e-3, rtol=1e-3)

    print("KERNEL_OK")
</pallas_src>

<mosaic_0001>
module attributes {stable_mosaic.version = 11 : i64} {
  func.func @_kernel_train(%arg0: i32, %arg1: memref<8x32xbf16, #tpu.memory_space<vmem>>, %arg2: memref<8x128xf32, #tpu.memory_space<vmem>>, %arg3: memref<32x128xbf16, #tpu.memory_space<vmem>>, %arg4: memref<1x128xf32, #tpu.memory_space<vmem>>, %arg5: memref<128x128xbf16, #tpu.memory_space<vmem>>, %arg6: memref<1x128xf32, #tpu.memory_space<vmem>>, %arg7: memref<128x128xbf16, #tpu.memory_space<vmem>>, %arg8: memref<1x128xf32, #tpu.memory_space<vmem>>, %arg9: memref<8x128xf32, #tpu.memory_space<vmem>>) attributes {dimension_semantics = [#tpu.dimension_semantics<parallel>], iteration_bounds = array<i64: 1>, scalar_prefetch = 0 : i64, scratch_operands = 0 : i64, tpu.core_type = #tpu.core_type<tc>, window_params = [{transform_indices = @transform_0, window_bounds = array<i64: 8, 32>}, {transform_indices = @transform_1, window_bounds = array<i64: 8, 128>}, {pipeline_mode = #tpu.pipeline_mode<synchronous>, transform_indices = @transform_2, window_bounds = array<i64: 32, 128>}, {pipeline_mode = #tpu.pipeline_mode<synchronous>, transform_indices = @transform_3, window_bounds = array<i64: 1, 128>}, {pipeline_mode = #tpu.pipeline_mode<synchronous>, transform_indices = @transform_4, window_bounds = array<i64: 128, 128>}, {pipeline_mode = #tpu.pipeline_mode<synchronous>, transform_indices = @transform_5, window_bounds = array<i64: 1, 128>}, {pipeline_mode = #tpu.pipeline_mode<synchronous>, transform_indices = @transform_6, window_bounds = array<i64: 128, 128>}, {pipeline_mode = #tpu.pipeline_mode<synchronous>, transform_indices = @transform_7, window_bounds = array<i64: 1, 128>}, {transform_indices = @transform_8, window_bounds = array<i64: 8, 128>}]} {
    %c0 = arith.constant 0 : index
    %c0_0 = arith.constant 0 : index
    %0 = vector.load %arg1[%c0, %c0_0] : memref<8x32xbf16, #tpu.memory_space<vmem>>, vector<8x32xbf16>
    %c0_1 = arith.constant 0 : index
    %c0_2 = arith.constant 0 : index
    %1 = vector.load %arg3[%c0_1, %c0_2] : memref<32x128xbf16, #tpu.memory_space<vmem>>, vector<32x128xbf16>
    %c0_3 = arith.constant 0 : index
    %c0_4 = arith.constant 0 : index
    %2 = vector.load %arg4[%c0_3, %c0_4] : memref<1x128xf32, #tpu.memory_space<vmem>>, vector<1x128xf32>
    %c0_5 = arith.constant 0 : index
    %c0_6 = arith.constant 0 : index
    %3 = vector.load %arg5[%c0_5, %c0_6] : memref<128x128xbf16, #tpu.memory_space<vmem>>, vector<128x128xbf16>
    %c0_7 = arith.constant 0 : index
    %c0_8 = arith.constant 0 : index
    %4 = vector.load %arg6[%c0_7, %c0_8] : memref<1x128xf32, #tpu.memory_space<vmem>>, vector<1x128xf32>
    %c0_9 = arith.constant 0 : index
    %c0_10 = arith.constant 0 : index
    %5 = vector.load %arg7[%c0_9, %c0_10] : memref<128x128xbf16, #tpu.memory_space<vmem>>, vector<128x128xbf16>
    %c0_11 = arith.constant 0 : index
    %c0_12 = arith.constant 0 : index
    %6 = vector.load %arg8[%c0_11, %c0_12] : memref<1x128xf32, #tpu.memory_space<vmem>>, vector<1x128xf32>
    %c0_13 = arith.constant 0 : index
    %c0_14 = arith.constant 0 : index
    %7 = vector.load %arg2[%c0_13, %c0_14] : memref<8x128xf32, #tpu.memory_space<vmem>>, vector<8x128xf32>
    %cst = arith.constant dense<0.000000e+00> : vector<8x128xf32>
    %8 = tpu.matmul %0, %1, %cst {dimension_numbers = #tpu.dot_dimension_numbers<[1], [0], [0], [1], [0, 0, 1, 1], [], []>} : vector<8x32xbf16>, vector<32x128xbf16>, vector<8x128xf32> -> vector<8x128xf32>
    %9 = vector.broadcast %2 : vector<1x128xf32> to vector<8x128xf32>
    %10 = arith.addf %8, %9 : vector<8x128xf32>
    %cst_15 = arith.constant 0.000000e+00 : f32
    %11 = vector.broadcast %cst_15 : f32 to vector<8x128xf32>
    %12 = arith.maximumf %10, %11 : vector<8x128xf32>
    %13 = arith.mulf %12, %7 : vector<8x128xf32>
    %14 = arith.truncf %13 : vector<8x128xf32> to vector<8x128xbf16>
    %cst_16 = arith.constant dense<0.000000e+00> : vector<8x128xf32>
    %15 = tpu.matmul %14, %3, %cst_16 {dimension_numbers = #tpu.dot_dimension_numbers<[1], [0], [0], [1], [0, 0, 1, 1], [], []>} : vector<8x128xbf16>, vector<128x128xbf16>, vector<8x128xf32> -> vector<8x128xf32>
    %16 = vector.broadcast %4 : vector<1x128xf32> to vector<8x128xf32>
    %17 = arith.addf %15, %16 : vector<8x128xf32>
    %cst_17 = arith.constant 0.000000e+00 : f32
    %18 = vector.broadcast %cst_17 : f32 to vector<8x128xf32>
    %19 = arith.maximumf %17, %18 : vector<8x128xf32>
    %20 = arith.truncf %19 : vector<8x128xf32> to vector<8x128xbf16>
    %cst_18 = arith.constant dense<0.000000e+00> : vector<8x128xf32>
    %21 = tpu.matmul %20, %5, %cst_18 {dimension_numbers = #tpu.dot_dimension_numbers<[1], [0], [0], [1], [0, 0, 1, 1], [], []>} : vector<8x128xbf16>, vector<128x128xbf16>, vector<8x128xf32> -> vector<8x128xf32>
    %22 = vector.broadcast %6 : vector<1x128xf32> to vector<8x128xf32>
    %23 = arith.addf %21, %22 : vector<8x128xf32>
    %c0_19 = arith.constant 0 : index
    %c0_20 = arith.constant 0 : index
    %24 = vector.load %arg9[%c0_19, %c0_20] : memref<8x128xf32, #tpu.memory_space<vmem>>, vector<8x128xf32>
    tpu.vector_store %arg9[%c0_19, %c0_20], %23 {strides = array<i32>} : memref<8x128xf32, #tpu.memory_space<vmem>>, vector<8x128xf32>,
    return
  }
  func.func @transform_0(%arg0: i32) -> (i32, i32) {
    %c0_i32 = arith.constant 0 : i32
    %c0_i32_0 = arith.constant 0 : i32
    return %arg0, %c0_i32 : i32, i32
  }
  func.func @transform_1(%arg0: i32) -> (i32, i32) {
    %c0_i32 = arith.constant 0 : i32
    %c0_i32_0 = arith.constant 0 : i32
    return %arg0, %c0_i32 : i32, i32
  }
  func.func @transform_2(%arg0: i32) -> (i32, i32) {
    %c0_i32 = arith.constant 0 : i32
    %c0_i32_0 = arith.constant 0 : i32
    %c0_i32_1 = arith.constant 0 : i32
    return %c0_i32, %c0_i32_0 : i32, i32
  }
  func.func @transform_3(%arg0: i32) -> (i32, i32) {
    %c0_i32 = arith.constant 0 : i32
    %c0_i32_0 = arith.constant 0 : i32
    %c0_i32_1 = arith.constant 0 : i32
    return %c0_i32, %c0_i32_0 : i32, i32
  }
  func.func @transform_4(%arg0: i32) -> (i32, i32) {
    %c0_i32 = arith.constant 0 : i32
    %c0_i32_0 = arith.constant 0 : i32
    %c0_i32_1 = arith.constant 0 : i32
    return %c0_i32, %c0_i32_0 : i32, i32
  }
  func.func @transform_5(%arg0: i32) -> (i32, i32) {
    %c0_i32 = arith.constant 0 : i32
    %c0_i32_0 = arith.constant 0 : i32
    %c0_i32_1 = arith.constant 0 : i32
    return %c0_i32, %c0_i32_0 : i32, i32
  }
  func.func @transform_6(%arg0: i32) -> (i32, i32) {
    %c0_i32 = arith.constant 0 : i32
    %c0_i32_0 = arith.constant 0 : i32
    %c0_i32_1 = arith.constant 0 : i32
    return %c0_i32, %c0_i32_0 : i32, i32
  }
  func.func @transform_7(%arg0: i32) -> (i32, i32) {
    %c0_i32 = arith.constant 0 : i32
    %c0_i32_0 = arith.constant 0 : i32
    %c0_i32_1 = arith.constant 0 : i32
    return %c0_i32, %c0_i32_0 : i32, i32
  }
  func.func @transform_8(%arg0: i32) -> (i32, i32) {
    %c0_i32 = arith.constant 0 : i32
    %c0_i32_0 = arith.constant 0 : i32
    return %arg0, %c0_i32 : i32, i32
  }
}

</mosaic_0001>

<bundles_post_ra>
// kernel: tpu_custom_call.1
= control target key start
LH: loop header
LB: loop body
LE: loop exit
PB: predicated region body
PF: predicated region fallthrough
CT: control target
= control target key end

     0   :  { %13 = vsyncpa [#allocation3], 0  ;;  %s665_s0 = inlined_call_operand.hbm [shape: bf16[8,32], index: 0, kind: input, shape index: {}]   ;;  %s666_s1 = inlined_call_operand.hbm [shape: f32[8,128], index: 1, kind: input, shape index: {}]   ;;  %s667_s2 = inlined_call_operand.hbm [shape: bf16[32,128], index: 2, kind: input, shape index: {}]   ;;  %s668_s3 = inlined_call_operand.vmem [shape: f32[1,128], index: 3, kind: input, shape index: {}]   ;;  %s669_s4 = inlined_call_operand.hbm [shape: bf16[128,128], index: 4, kind: input, shape index: {}]   ;;  %s670_s5 = inlined_call_operand.vmem [shape: f32[1,128], index: 5, kind: input, shape index: {}]   ;;  %s671_s6 = inlined_call_operand.hbm [shape: bf16[128,128], index: 6, kind: input, shape index: {}]   ;;  %s672_s7 = inlined_call_operand.vmem [shape: f32[1,128], index: 7, kind: input, shape index: {}]   ;;  %s673_s8 = inlined_call_operand.hbm [shape: f32[8,128], index: 8, kind: output, shape index: {}]  }
   0x1   :  { %14 = vsyncpa [#allocation6], 0 }
   0x2   :  { %15 = vsyncpa [#allocation9], 0  ;;  %s33_s29 = sshll.u32 %s666_s1, 4  ;;  %s34_s29 = int_to_ptr.hbm [resolvable:$true] %s33_s29 }
   0x3   :  { %16 = vsyncpa [#allocation4], 0  ;;  %s585_s30 = smov [#allocation5]   ;;  %s58_s12 = sshll.u32 %s669_s4, 4  ;;  %s59_s12 = int_to_ptr.hbm [resolvable:$true] %s58_s12 }
   0x4   :  { %s35_s9 = sshll.u32 %s585_s30, 4  ;;  %s586_s13 = smov [#allocation8]   ;;  %s36_s9 = int_to_ptr.vmem [resolvable:$true] %s35_s9 }
   0x5   :  { %38 = dma.hbm_to_vmem [thread:$0]  %s34_s29, 128, %s36_s9, [#allocation6]  }
   0x6   :  { %s60_s14 = sshll.u32 %s586_s13, 4  ;;  %s22_s17 = sshll.u32 %s665_s0, 4  ;;  %s61_s14 = int_to_ptr.vmem [resolvable:$true] %s60_s14  ;;  %s23_s17 = int_to_ptr.hbm [resolvable:$true] %s22_s17 }
   0x7   :  { %s587_s1 = smov 64   ;;  %s588_s18 = smov 4  }
   0x8   :  { %66 = dma.hbm_to_vmem [thread:$0]  %s59_s12, 1024, %s61_s14, [#allocation9], %s587_s1, %s587_s1, %s588_s18  }
   0x9   :  { %s43_s21 = sshll.u32 %s667_s2, 4  ;;  %s589_s22 = smov [#allocation2]   ;;  %s44_s21 = int_to_ptr.hbm [resolvable:$true] %s43_s21 }
   0xa   :  { %s24_s23 = sshll.u32 %s589_s22, 4  ;;  %s590_s4 = smov [#allocation7]   ;;  %s25_s23 = int_to_ptr.vmem [resolvable:$true] %s24_s23 }
   0xb   :  { %27 = dma.hbm_to_vmem [thread:$0]  %s23_s17, 64, %s25_s23, [#allocation3]  }
   0xc   :  { %s45_s24 = sshll.u32 %s590_s4, 4  ;;  %s73_s0 = sshll.u32 %s671_s6, 4  ;;  %s46_s24 = int_to_ptr.vmem [resolvable:$true] %s45_s24  ;;  %s74_s0 = int_to_ptr.hbm [resolvable:$true] %s73_s0 }
   0xd   :  { %51 = dma.hbm_to_vmem [thread:$0]  %s44_s21, 256, %s46_s24, [#allocation6], %s587_s1, %s587_s1, %s588_s18  }
   0xe   :  { %s591_s27 = smov [#allocation10]  }
   0xf   :  { %s75_s28 = sshll.u32 %s591_s27, 4  ;;  %s76_s28 = int_to_ptr.vmem [resolvable:$true] %s75_s28 }
  0x10   :  { %81 = dma.hbm_to_vmem [thread:$0]  %s74_s0, 1024, %s76_s28, [#allocation9], %s587_s1, %s587_s1, %s588_s18  }
  0x11   :  { %577 = dma.done.wait [#allocation3], 64  }
  0x12   :  { %578 = vsyncadd [#allocation3], 4294967232 }
  0x13   :  { %579 = dma.done.wait [#allocation6], 384  }
  0x14   :  { %580 = vsyncadd [#allocation6], 4294966912 }
  0x15   :  { %581 = dma.done.wait [#allocation9], 2048  }
  0x16   :  { %582 = vsyncadd [#allocation9], 4294965248  ;;  %v405_v0 = vld [vmem:[#allocation7 + $0x8] sm:$0xff]  ;;  %v404_v2 = vld [vmem:[#allocation7] sm:$0xff]  ;;  %vm161_vm0 = vcmask 261120   ;;  %s592_s10 = smov [#allocation11]  }
  0x17   :  { %v413_v1 = vld [vmem:[#allocation8 + $0x38] sm:$0xff]  ;;  %171 = vmatpush.bf16.msra.mxu0 %v405_v0  ;;  %v412_v3 = vld [vmem:[#allocation8 + $0x30] sm:$0xff]  ;;  %v105_v4 = vld [vmem:[#allocation2] sm:$0xf]  ;;  %s317_s11 = sshll.u32 %s592_s10, 4  ;;  %s319_s14 = sshll.u32 %s673_s8, 4  ;;  %s318_s11 = int_to_ptr.vmem [resolvable:$true] %s317_s11  ;;  %s320_s14 = int_to_ptr.hbm [resolvable:$true] %s319_s14 }
  0x18   :  { %232 = vmatpush.bf16.msra.mxu1 %v413_v1  ;;  %v411_v5 = vld [vmem:[#allocation8 + $0x28] sm:$0xff]  ;;  %v410_v6 = vld [vmem:[#allocation8 + $0x20] sm:$0xff]  ;;  %v409_v7 = vld [vmem:[#allocation8 + $0x18] sm:$0xff] }
  0x19   :  { %v408_v8 = vld [vmem:[#allocation8 + $0x10] sm:$0xff]  ;;  %v407_v9 = vld [vmem:[#allocation8 + $0x8] sm:$0xff]  ;;  %v406_v10 = vld [vmem:[#allocation8] sm:$0xff] }
  0x1a   :  { %v421_v11 = vld [vmem:[#allocation10 + $0x38] sm:$0xff]  ;;  %v420_v12 = vld [vmem:[#allocation10 + $0x30] sm:$0xff]  ;;  %v419_v13 = vld [vmem:[#allocation10 + $0x28] sm:$0xff] }
  0x1b   :  { %172 = vmatpush.bf16.msra.mxu0 %v404_v2  ;;  %298 = vmatpush.bf16.msra.mxu2 %v421_v11  ;;  %v418_v14 = vld [vmem:[#allocation10 + $0x20] sm:$0xff]  ;;  %v417_v15 = vld [vmem:[#allocation10 + $0x18] sm:$0xff]  ;;  %v416_v16 = vld [vmem:[#allocation10 + $0x10] sm:$0xff] }
  0x1c   :  { %233 = vmatpush.bf16.msra.mxu1 %v412_v3  ;;  %v430_v17 = vld [vmem:[%s668_s3] ss:$0 sm:$0xff]  ;;  %v145_v20 = vld [vmem:[#allocation5] sm:$0xff] }
  0x1d   :  { %v415_v25 = vld [vmem:[#allocation10 + $0x8] sm:$0xff]  ;;  %v414_v26 = vld [vmem:[#allocation10] sm:$0xff] }
  0x1e   :  { %339 = vmatmul.msk.bf16.vlgmr.msra.gmra.mxu0 %vm161_vm0, %v105_v4  ;;  %v431_v27 = vld [vmem:[%s670_s5] ss:$0 sm:$0xff] }
  0x1f   :  { %299 = vmatpush.bf16.msra.mxu2 %v420_v12  ;;  %v432_v33 = vld [vmem:[%s672_s7] ss:$0 sm:$0xff] }
  0x20   :  { %234 = vmatpush.bf16.msra.mxu1 %v411_v5 }
  0x23   :  { %300 = vmatpush.bf16.msra.mxu2 %v419_v13 }
  0x24   :  { %235 = vmatpush.bf16.msra.mxu1 %v410_v6 }
  0x27   :  { %301 = vmatpush.bf16.msra.mxu2 %v418_v14 }
  0x28   :  { %236 = vmatpush.bf16.msra.mxu1 %v409_v7 }
  0x2b   :  { %302 = vmatpush.bf16.msra.mxu2 %v417_v15 }
  0x2c   :  { %237 = vmatpush.bf16.msra.mxu1 %v408_v8 }
  0x2f   :  { %303 = vmatpush.bf16.msra.mxu2 %v416_v16 }
  0x30   :  { %238 = vmatpush.bf16.msra.mxu1 %v407_v9 }
  0x33   :  { %304 = vmatpush.bf16.msra.mxu2 %v415_v25 }
  0x34   :  { %239 = vmatpush.bf16.msra.mxu1 %v406_v10 }
  0x37   :  { %305 = vmatpush.bf16.msra.mxu2 %v414_v26 }
  0x9b   :  { %v174_v18 = vpop.f32.mrf.mxu0 }
  0x9c   :  { %v175_v19 = vadd.f32 %v430_v17, %v174_v18 }
  0x9e   :  { %v178_v21 = vmax.f32 %v175_v19, 0.0 }
  0xa0   :  { %v179_v22 = vmul.f32 %v178_v21, %v145_v20 }
  0xa2   :  { %v180_v23 = vpack.c.bf16 %v179_v22, %v179_v22 }
  0xa3   :  { %v176_v24 = vpop.f32.mrf.mxu0 }
  0xa4   :  { %240 = vmatmul.bf16.vlgmr.msra.gmra.mxu1 %v180_v23 }
 0x121   :  { %v241_v28 = vpop.f32.mrf.mxu1 }
 0x122   :  { %v242_v29 = vadd.f32 %v431_v27, %v241_v28 }
 0x124   :  { %v245_v30 = vmax.f32 %v242_v29, 0.0 }
 0x126   :  { %v246_v31 = vpack.c.bf16 %v245_v30, %v245_v30 }
 0x128   :  { %306 = vmatmul.bf16.vlgmr.msra.gmra.mxu2 %v246_v31 }
 0x129   :  { %v243_v32 = vpop.f32.mrf.mxu1 }
 0x1ab   :  { %v307_v34 = vpop.f32.mrf.mxu2 }
 0x1ac   :  { %v308_v35 = vadd.f32 %v432_v33, %v307_v34 }
 0x1ae   :  { %311 = vst [vmem:[#allocation11] sm:$0xff] %v308_v35 }
 0x1af   :  { %322 = dma.vmem_to_hbm [thread:$0]  %s318_s11, 128, %s320_s14, [#allocation4]  }
 0x1b3   :  { %v309_v36 = vpop.f32.mrf.mxu2 }
 0x1b4   :  { %583 = dma.done.wait [#allocation4], 128  }
 0x1b5   :  { %584 = vsyncadd [#allocation4], 4294967168 }
 0x1b6   :  { %327 = vsyncpa [#allocation3], 1 }
 0x1b7   :  { %328 = vsyncpa [#allocation6], 1 }
 0x1b8   :  { %329 = vsyncpa [#allocation9], 1 }
 0x1b9   :  { %330 = vsyncpa [#allocation4], 1 }

</bundles_post_ra>
